<compile_context>
chip_gen: v7x
topology: tpu7x:2x2x1
jax: 0.10.0
libtpu: 0.0.40
codegen_flags: <defaults>
</compile_context>

<pallas_src>
import functools

import jax
import jax.numpy as jnp
from jax.experimental import pallas as pl
from jax.experimental.pallas import tpu as pltpu


_LANE = 128          # lane width of a vreg
_MAX_TILE_ROWS = 512  # 512 rows * 128 lanes * (4+2) ch * 4 B = 1.5 MiB / step


def _choose_row_tile(nrows):
    """Pick a sublane-row tile (TR) and padded row count for the HW axis."""
    if nrows <= _MAX_TILE_ROWS:
        # Full extent of the axis: always a legal block shape.
        return nrows, nrows
    # Largest multiple-of-8 divisor <= _MAX_TILE_ROWS (avoids input padding).
    for tr in range(_MAX_TILE_ROWS, 7, -8):
        if nrows % tr == 0:
            return tr, nrows
    # No clean divisor: pad the row axis up to a multiple of 256.
    tr = 256
    return tr, ((nrows + tr - 1) // tr) * tr


def _project3d_kernel(p_ref, pts_ref, out_ref, *, eps):
    """One (batch, HW-tile) grid step.

    p_ref   : SMEM (B, 12)        pre-scaled rows of P = (K @ T)[:3, :]
    pts_ref : VMEM (1, 4, TR, 128) homogeneous points, lane-dense slabs
    out_ref : VMEM (1, 2, TR, 128) normalised pixel coords (planar x / y)
    """
    b = pl.program_id(0)

    x = pts_ref[0, 0]       # (TR, 128)
    y = pts_ref[0, 1]
    z = pts_ref[0, 2]
    w = pts_ref[0, 3]

    def cam_row(r):
        # Scalar(SMEM)-broadcast FMAs on full-density slabs; no MXU, no pads.
        return (p_ref[b, 4 * r + 0] * x
                + p_ref[b, 4 * r + 1] * y
                + p_ref[b, 4 * r + 2] * z
                + p_ref[b, 4 * r + 3] * w)

    denom = cam_row(2) + eps          # unscaled depth row
    inv = 1.0 / denom                 # one reciprocal, reused for x and y

    # Normalisation scale is already folded into P rows 0/1: result = s*cam/denom - 1
    out_ref[0, 0] = cam_row(0) * inv - 1.0
    out_ref[0, 1] = cam_row(1) * inv - 1.0


def project3d(points, K, T, *, batch_size, height, width, eps=1e-7):
    """points: [B, 4, H*W]; K, T: [B, 4, 4] -> [B, H, W, 2] (torch semantics)."""
    B, H, W = batch_size, height, width
    HW = H * W
    assert points.shape == (B, 4, HW)
    assert K.shape == (B, 4, 4) and T.shape == (B, 4, 4)

    # ---- tiny host-side prep (XLA): P = (K@T)[:, :3, :] with normalisation
    #      folded into rows 0 and 1 ( (v/(dim-1) - 0.5)*2 == (2/(dim-1))*v - 1 ).
    P = jnp.matmul(K.astype(jnp.float32), T.astype(jnp.float32))[:, :3, :]
    row_scale = jnp.array([2.0 / (W - 1), 2.0 / (H - 1), 1.0],
                          dtype=jnp.float32).reshape(1, 3, 1)
    P = (P * row_scale).reshape(B, 12)          # flat layout for SMEM

    # ---- lay points out as full (sublane, lane) slabs: [B, 4, nrows, 128].
    pts = points.astype(jnp.float32)
    nrows = -(-HW // _LANE)                     # ceil(HW / 128)
    tile_rows, nrows_pad = _choose_row_tile(nrows)
    hw_pad = nrows_pad * _LANE
    if hw_pad != HW:
        pts = jnp.pad(pts, ((0, 0), (0, 0), (0, hw_pad - HW)))
    pts = pts.reshape(B, 4, nrows_pad, _LANE)

    grid = (B, nrows_pad // tile_rows)
    kernel = functools.partial(_project3d_kernel, eps=eps)

    out = pl.pallas_call(
        kernel,
        out_shape=jax.ShapeDtypeStruct((B, 2, nrows_pad, _LANE), jnp.float32),
        grid_spec=pltpu.PrefetchScalarGridSpec(
            num_scalar_prefetch=0,
            grid=grid,
            in_specs=[
                # Whole (B, 12) projection-matrix table lives in SMEM.
                pl.BlockSpec(memory_space=pltpu.MemorySpace.SMEM),
                pl.BlockSpec((1, 4, tile_rows, _LANE),
                             lambda b, t: (b, 0, t, 0)),
            ],
            out_specs=pl.BlockSpec((1, 2, tile_rows, _LANE),
                                   lambda b, t: (b, 0, t, 0)),
        ),
        compiler_params=pltpu.CompilerParams(
            dimension_semantics=("parallel", "parallel")),
    )(P, pts)

    # ---- layout glue back to the module's [B, H, W, 2].
    out = out.reshape(B, 2, hw_pad)[:, :, :HW].reshape(B, 2, H, W)
    # TODO(synk): the planar->NHWC x/y interleave stays in XLA; doing it
    # in-kernel would need a cross-lane interleave with no clean Pallas TPU op.
    return jnp.transpose(out, (0, 2, 3, 1))


def _project3d_ref(points, K, T, *, batch_size, height, width, eps=1e-7):
    """Pure-JAX reference matching the PyTorch module."""
    P = jnp.matmul(K, T)[:, :3, :]
    cam = jnp.matmul(P, points)
    pix = cam[:, :2, :] / (cam[:, 2:3, :] + eps)
    pix = pix.reshape(batch_size, 2, height, width)
    pix = jnp.transpose(pix, (0, 2, 3, 1))
    pix = pix.at[..., 0].divide(width - 1)
    pix = pix.at[..., 1].divide(height - 1)
    return (pix - 0.5) * 2


if __name__ == "__main__":
    B, H, W = 2, 16, 16
    HW = H * W

    key = jax.random.PRNGKey(0)
    k_xy, k_z, k_K, k_T = jax.random.split(key, 4)

    # Homogeneous 3D points (last row = 1) with positive depth.
    xy = jax.random.normal(k_xy, (B, 2, HW), dtype=jnp.float32)
    z = jax.random.uniform(k_z, (B, 1, HW), dtype=jnp.float32,
                           minval=1.0, maxval=3.0)
    ones = jnp.ones((B, 1, HW), dtype=jnp.float32)
    points = jnp.concatenate([xy, z, ones], axis=1)          # [B, 4, HW]

    # Deterministic synthetic intrinsics K and pose T (4x4, batched).
    K_base = jnp.array([[0.58 * W, 0.0,      0.5 * W, 0.0],
                        [0.0,      1.92 * H, 0.5 * H, 0.0],
                        [0.0,      0.0,      1.0,     0.0],
                        [0.0,      0.0,      0.0,     1.0]], dtype=jnp.float32)
    K = jnp.broadcast_to(K_base, (B, 4, 4)) + \
        0.01 * jax.random.normal(k_K, (B, 4, 4), dtype=jnp.float32)

    T_base = jnp.eye(4, dtype=jnp.float32)
    T = jnp.broadcast_to(T_base, (B, 4, 4)) + \
        0.05 * jax.random.normal(k_T, (B, 4, 4), dtype=jnp.float32)

    out = project3d(points, K, T, batch_size=B, height=H, width=W)
    out = jax.block_until_ready(out)

    ref = _project3d_ref(points, K, T, batch_size=B, height=H, width=W)
    assert out.shape == (B, H, W, 2)
    assert jnp.allclose(out, ref, atol=1e-4, rtol=1e-4), "mismatch vs reference"

    print("KERNEL_OK")
</pallas_src>

<mosaic_0001>
module attributes {stable_mosaic.version = 11 : i64} {
  func.func @_project3d_kernel(%arg0: i32, %arg1: i32, %arg2: memref<2x12xf32, #tpu.memory_space<smem>>, %arg3: memref<1x4x2x128xf32, #tpu.memory_space<vmem>>, %arg4: memref<1x2x2x128xf32, #tpu.memory_space<vmem>>) attributes {dimension_semantics = [#tpu.dimension_semantics<parallel>, #tpu.dimension_semantics<parallel>], iteration_bounds = array<i64: 2, 1>, scalar_prefetch = 0 : i64, scratch_operands = 0 : i64, tpu.core_type = #tpu.core_type<tc>, window_params = [{transform_indices = @transform_0, window_bounds = array<i64: 2, 12>}, {transform_indices = @transform_1, window_bounds = array<i64: 1, 4, 2, 128>}, {transform_indices = @transform_2, window_bounds = array<i64: 1, 2, 2, 128>}]} {
    %c0 = arith.constant 0 : index
    %c0_0 = arith.constant 0 : index
    %c0_1 = arith.constant 0 : index
    %c0_2 = arith.constant 0 : index
    %0 = vector.load %arg3[%c0, %c0_0, %c0_1, %c0_2] : memref<1x4x2x128xf32, #tpu.memory_space<vmem>>, vector<1x1x2x128xf32>
    %1 = vector.shape_cast %0 : vector<1x1x2x128xf32> to vector<2x128xf32>
    %c0_3 = arith.constant 0 : index
    %c1 = arith.constant 1 : index
    %c0_4 = arith.constant 0 : index
    %c0_5 = arith.constant 0 : index
    %2 = vector.load %arg3[%c0_3, %c1, %c0_4, %c0_5] : memref<1x4x2x128xf32, #tpu.memory_space<vmem>>, vector<1x1x2x128xf32>
    %3 = vector.shape_cast %2 : vector<1x1x2x128xf32> to vector<2x128xf32>
    %c0_6 = arith.constant 0 : index
    %c2 = arith.constant 2 : index
    %c0_7 = arith.constant 0 : index
    %c0_8 = arith.constant 0 : index
    %4 = vector.load %arg3[%c0_6, %c2, %c0_7, %c0_8] : memref<1x4x2x128xf32, #tpu.memory_space<vmem>>, vector<1x1x2x128xf32>
    %5 = vector.shape_cast %4 : vector<1x1x2x128xf32> to vector<2x128xf32>
    %c0_9 = arith.constant 0 : index
    %c3 = arith.constant 3 : index
    %c0_10 = arith.constant 0 : index
    %c0_11 = arith.constant 0 : index
    %6 = vector.load %arg3[%c0_9, %c3, %c0_10, %c0_11] : memref<1x4x2x128xf32, #tpu.memory_space<vmem>>, vector<1x1x2x128xf32>
    %7 = vector.shape_cast %6 : vector<1x1x2x128xf32> to vector<2x128xf32>
    %8 = arith.index_cast %arg0 : i32 to index
    %c8 = arith.constant 8 : index
    %9 = memref.load %arg2[%8, %c8] : memref<2x12xf32, #tpu.memory_space<smem>>
    %10 = vector.broadcast %9 : f32 to vector<2x128xf32>
    %11 = arith.mulf %10, %1 : vector<2x128xf32>
    %12 = arith.index_cast %arg0 : i32 to index
    %c9 = arith.constant 9 : index
    %13 = memref.load %arg2[%12, %c9] : memref<2x12xf32, #tpu.memory_space<smem>>
    %14 = vector.broadcast %13 : f32 to vector<2x128xf32>
    %15 = arith.mulf %14, %3 : vector<2x128xf32>
    %16 = arith.addf %11, %15 : vector<2x128xf32>
    %17 = arith.index_cast %arg0 : i32 to index
    %c10 = arith.constant 10 : index
    %18 = memref.load %arg2[%17, %c10] : memref<2x12xf32, #tpu.memory_space<smem>>
    %19 = vector.broadcast %18 : f32 to vector<2x128xf32>
    %20 = arith.mulf %19, %5 : vector<2x128xf32>
    %21 = arith.addf %16, %20 : vector<2x128xf32>
    %22 = arith.index_cast %arg0 : i32 to index
    %c11 = arith.constant 11 : index
    %23 = memref.load %arg2[%22, %c11] : memref<2x12xf32, #tpu.memory_space<smem>>
    %24 = vector.broadcast %23 : f32 to vector<2x128xf32>
    %25 = arith.mulf %24, %7 : vector<2x128xf32>
    %26 = arith.addf %21, %25 : vector<2x128xf32>
    %cst = arith.constant 1.000000e-07 : f32
    %27 = vector.broadcast %cst : f32 to vector<2x128xf32>
    %28 = arith.addf %26, %27 : vector<2x128xf32>
    %cst_12 = arith.constant 1.000000e+00 : f32
    %29 = vector.broadcast %cst_12 : f32 to vector<2x128xf32>
    %30 = arith.divf %29, %28 : vector<2x128xf32>
    %31 = arith.index_cast %arg0 : i32 to index
    %c0_13 = arith.constant 0 : index
    %32 = memref.load %arg2[%31, %c0_13] : memref<2x12xf32, #tpu.memory_space<smem>>
    %33 = vector.broadcast %32 : f32 to vector<2x128xf32>
    %34 = arith.mulf %33, %1 : vector<2x128xf32>
    %35 = arith.index_cast %arg0 : i32 to index
    %c1_14 = arith.constant 1 : index
    %36 = memref.load %arg2[%35, %c1_14] : memref<2x12xf32, #tpu.memory_space<smem>>
    %37 = vector.broadcast %36 : f32 to vector<2x128xf32>
    %38 = arith.mulf %37, %3 : vector<2x128xf32>
    %39 = arith.addf %34, %38 : vector<2x128xf32>
    %40 = arith.index_cast %arg0 : i32 to index
    %c2_15 = arith.constant 2 : index
    %41 = memref.load %arg2[%40, %c2_15] : memref<2x12xf32, #tpu.memory_space<smem>>
    %42 = vector.broadcast %41 : f32 to vector<2x128xf32>
    %43 = arith.mulf %42, %5 : vector<2x128xf32>
    %44 = arith.addf %39, %43 : vector<2x128xf32>
    %45 = arith.index_cast %arg0 : i32 to index
    %c3_16 = arith.constant 3 : index
    %46 = memref.load %arg2[%45, %c3_16] : memref<2x12xf32, #tpu.memory_space<smem>>
    %47 = vector.broadcast %46 : f32 to vector<2x128xf32>
    %48 = arith.mulf %47, %7 : vector<2x128xf32>
    %49 = arith.addf %44, %48 : vector<2x128xf32>
    %50 = arith.mulf %49, %30 : vector<2x128xf32>
    %cst_17 = arith.constant 1.000000e+00 : f32
    %51 = vector.broadcast %cst_17 : f32 to vector<2x128xf32>
    %52 = arith.subf %50, %51 : vector<2x128xf32>
    %c0_18 = arith.constant 0 : index
    %c0_19 = arith.constant 0 : index
    %c0_20 = arith.constant 0 : index
    %c0_21 = arith.constant 0 : index
    %53 = vector.load %arg4[%c0_18, %c0_19, %c0_20, %c0_21] : memref<1x2x2x128xf32, #tpu.memory_space<vmem>>, vector<1x1x2x128xf32>
    %54 = vector.shape_cast %53 : vector<1x1x2x128xf32> to vector<2x128xf32>
    %55 = vector.shape_cast %52 : vector<2x128xf32> to vector<1x1x2x128xf32>
    tpu.vector_store %arg4[%c0_18, %c0_19, %c0_20, %c0_21], %55 {strides = array<i32>} : memref<1x2x2x128xf32, #tpu.memory_space<vmem>>, vector<1x1x2x128xf32>,
    %56 = arith.index_cast %arg0 : i32 to index
    %c4 = arith.constant 4 : index
    %57 = memref.load %arg2[%56, %c4] : memref<2x12xf32, #tpu.memory_space<smem>>
    %58 = vector.broadcast %57 : f32 to vector<2x128xf32>
    %59 = arith.mulf %58, %1 : vector<2x128xf32>
    %60 = arith.index_cast %arg0 : i32 to index
    %c5 = arith.constant 5 : index
    %61 = memref.load %arg2[%60, %c5] : memref<2x12xf32, #tpu.memory_space<smem>>
    %62 = vector.broadcast %61 : f32 to vector<2x128xf32>
    %63 = arith.mulf %62, %3 : vector<2x128xf32>
    %64 = arith.addf %59, %63 : vector<2x128xf32>
    %65 = arith.index_cast %arg0 : i32 to index
    %c6 = arith.constant 6 : index
    %66 = memref.load %arg2[%65, %c6] : memref<2x12xf32, #tpu.memory_space<smem>>
    %67 = vector.broadcast %66 : f32 to vector<2x128xf32>
    %68 = arith.mulf %67, %5 : vector<2x128xf32>
    %69 = arith.addf %64, %68 : vector<2x128xf32>
    %70 = arith.index_cast %arg0 : i32 to index
    %c7 = arith.constant 7 : index
    %71 = memref.load %arg2[%70, %c7] : memref<2x12xf32, #tpu.memory_space<smem>>
    %72 = vector.broadcast %71 : f32 to vector<2x128xf32>
    %73 = arith.mulf %72, %7 : vector<2x128xf32>
    %74 = arith.addf %69, %73 : vector<2x128xf32>
    %75 = arith.mulf %74, %30 : vector<2x128xf32>
    %cst_22 = arith.constant 1.000000e+00 : f32
    %76 = vector.broadcast %cst_22 : f32 to vector<2x128xf32>
    %77 = arith.subf %75, %76 : vector<2x128xf32>
    %c0_23 = arith.constant 0 : index
    %c1_24 = arith.constant 1 : index
    %c0_25 = arith.constant 0 : index
    %c0_26 = arith.constant 0 : index
    %78 = vector.load %arg4[%c0_23, %c1_24, %c0_25, %c0_26] : memref<1x2x2x128xf32, #tpu.memory_space<vmem>>, vector<1x1x2x128xf32>
    %79 = vector.shape_cast %78 : vector<1x1x2x128xf32> to vector<2x128xf32>
    %80 = vector.shape_cast %77 : vector<2x128xf32> to vector<1x1x2x128xf32>
    tpu.vector_store %arg4[%c0_23, %c1_24, %c0_25, %c0_26], %80 {strides = array<i32>} : memref<1x2x2x128xf32, #tpu.memory_space<vmem>>, vector<1x1x2x128xf32>,
    return
  }
  func.func @transform_0(%arg0: i32, %arg1: i32) -> (i32, i32) {
    %c0_i32 = arith.constant 0 : i32
    %c0_i32_0 = arith.constant 0 : i32
    %c0_i32_1 = arith.constant 0 : i32
    return %c0_i32, %c0_i32_0 : i32, i32
  }
  func.func @transform_1(%arg0: i32, %arg1: i32) -> (i32, i32, i32, i32) {
    %c0_i32 = arith.constant 0 : i32
    %c0_i32_0 = arith.constant 0 : i32
    %c0_i32_1 = arith.constant 0 : i32
    return %arg0, %c0_i32, %arg1, %c0_i32_0 : i32, i32, i32, i32
  }
  func.func @transform_2(%arg0: i32, %arg1: i32) -> (i32, i32, i32, i32) {
    %c0_i32 = arith.constant 0 : i32
    %c0_i32_0 = arith.constant 0 : i32
    %c0_i32_1 = arith.constant 0 : i32
    return %arg0, %c0_i32, %arg1, %c0_i32_0 : i32, i32, i32, i32
  }
}

</mosaic_0001>

<bundles_post_ra>
// kernel: tpu_custom_call.1
= control target key start
LH: loop header
LB: loop body
LE: loop exit
PB: predicated region body
PF: predicated region fallthrough
CT: control target
= control target key end

     0   :  { %7 = vsyncpa [#allocation5], 0  ;;  %s861_s0 = inlined_call_operand.hbm [shape: f32[2,12], index: 0, kind: input, shape index: {}]   ;;  %s862_s1 = inlined_call_operand.hbm [shape: f32[2,4,2,128], index: 1, kind: input, shape index: {}]   ;;  %s863_s2 = inlined_call_operand.hbm [shape: f32[2,2,2,128], index: 2, kind: output, shape index: {}]  }
   0x1   :  { %8 = vsyncpa [#allocation3], 0 }
   0x2   :  { %10 = vsyncpa [#allocation3 + $0x1], 0 }
   0x3   :  { %11 = vsyncpa [#allocation4], 0 }
   0x4   :  { %13 = vsyncpa [#allocation4 + $0x1], 0  ;;  %s635_s9 = smov 0   ;;  %s637_s10 = smov 0  }
   0x5   :  { %s639_s11 = smov 0   ;;  %s641_s12 = smov 0  }
   0x6   :  { %s643_s13 = smov 0   ;;  %s645_s14 = smov 0  }
   0x7 LB: > { %s377_s15 = sadd.s32 4294967295, %s611_s14   ;;  %s378_s16 = sadd.s32 4294967294, %s611_s14   ;;  %s611_s14 = sphi %s645_s14, %s19_s14   ;;  %s607_s13 = sphi %s643_s13, %s883_s13   ;;  %s603_s12 = sphi %s641_s12, %s882_s12   ;;  %s599_s11 = sphi %s639_s11, %s881_s11   ;;  %s595_s10 = sphi %s637_s10, %s880_s10   ;;  %s591_s9 = sphi %s635_s9, %s879_s9  }
   0x8   : > { %s61_s17 = sadd.s32 1, %s599_s11  ;;  %p68_p0 = scmp.ne.s32.totalorder %s599_s11, %s595_s10 }
   0x9   : > { %p69_p1 = scmp.eq.s32.totalorder %s611_s14, 0  ;;  %p74_p2 = scmp.ne.s32.totalorder %s595_s10, %s591_s9 }
   0xa   : > { %p673_p3 = scmp.eq.s32.totalorder %s377_s15, 0  ;;  %p100_p4 = scmp.eq.s32.totalorder %s377_s15, 1 }
   0xb   : > { %p70_p5 = por %p69_p1, %p68_p0  ;;  %p106_p6 = scmp.eq.s32.totalorder %s378_s16, 1 }
   0xc   : > { %s868_s18 = scalar_select %p673_p3, 1, 0 }
   0xd   : > { %p679_p7 = por %p673_p3, %p74_p2  ;;  %p683_p8 = por %p100_p4, %p68_p0 }
   0xe   : > { %p687_p9 = por %p106_p6, %p74_p2  ;;  %p379_p10 = scmp.ge.s32.totalorder %s611_s14, 1 }
   0xf   : > { %s869_s19 = scalar_select %p679_p7, 1, 0 }
  0x10   : > { %s870_s20 = scalar_select %p683_p8, 1, 0 }
  0x11   : > { %s871_s21 = scalar_select %p687_p9, 1, 0 }
  0x12   : > { %p113_p11 = scmp.lt.s32.totalorder %s611_s14, 3  ;;  %p424_p1 = scmp.lt.s32.totalorder %s611_s14, 2 }
  0x13   : > { %s135_s23 = sand.u32 1, %s599_s11   ;;  %s31_s25 = sadd.s32 1, %s607_s13 }
  0x14   : > { %p694_p13 = pnand %p379_p10, %p113_p11  ;;  %p702_p0 = pnand %p424_p1, %p70_p5 }
  0x15   : > { %s382_s26 = sshll.u32 %s135_s23, 3  ;;  %p33_p4 = scmp.ge.s32.totalorder %s31_s25, 2 }
  0x16   : > { %p411_p7 = pneg %p694_p13  ;;  %s482_s29 = scalar_lea.hbm %s861_s0, 32 }
  0x17   : > { %p483_p6 = scmp.ne.s32.totalorder %s861_s0, %s482_s29  ;;  %p489_p5 = scmp.lt.u32.totalorder %s482_s29, %s861_s0 }
  0x18   : > { %p412_p2 = pnand %p411_p7, %p673_p3 }
  0x1a   : > { %p484_p10 = pneg %p412_p2 }
  0x1c   : > { %p485_p11 = pnand %p484_p10, %p483_p6 }
  0x1e   : > { %p486_p12 = pneg %p485_p11 }
  0x20   : > { %p491_p1 = pnand %p489_p5, %p486_p12 }
  0x22   : > { %494 = shalt.err (!%p491_p1)
}
  0x23   : > { %s613_s6 = smov [#allocation2]   ;;  %s885_s25 = smov (%p33_p4, %s31_s25), 0 }
  0x24   : > { %414 = dma.hbm_to_smem (!%p412_p2), %s861_s0, 32, %s613_s6, [#allocation5]  }
  0x25   : > { %s401_s15 = sshll.u32 %s607_s13, 7  ;;  %s56_s16 = ssub.s32 %s607_s13, %s885_s25 }
  0x26   : > { %s729_s29 = scalar_lea.hbm %s862_s1, %s401_s15  ;;  %p59_p7 = scmp.eq.s32.totalorder %s56_s16, 0 }
  0x27   : > { %s139_s30 = scalar_lea.vmem [#allocation6], %s382_s26  ;;  %s738_s5 = scalar_lea.sflag [#allocation3], %s135_s23 }
  0x28   : > { %s147_s3 = sshll.u32 %s139_s30, 4  ;;  %s495_s6 = scalar_lea.hbm %s729_s29, 128  ;;  %s731_s3 = int_to_ptr.vmem [resolvable:$true] %s147_s3 }
  0x29   : > { %s736_s4 = scalar_select %p59_p7, %s599_s11, %s61_s17  }
  0x2a   : > { %p496_p12 = scmp.ne.s32.totalorder %s729_s29, %s495_s6  ;;  %p497_p2 = pneg %p702_p0 }
  0x2b   : > { %s500_s26 = scalar_lea.hbm %s862_s1, 256  ;;  %p501_p10 = scmp.lt.u32.totalorder %s729_s29, %s862_s1 }
  0x2c   : > { %p498_p4 = pnand %p497_p2, %p496_p12  ;;  %p502_p11 = scmp.lt.u32.totalorder %s500_s26, %s495_s6 }
  0x2d   : > { %p504_p1 = scmp.lt.u32.totalorder %s495_s6, %s729_s29 }
  0x2e   : > { %p499_p6 = pneg %p498_p4  ;;  %p503_p5 = por %p502_p11, %p501_p10 }
  0x30   : > { %p505_p7 = por %p504_p1, %p503_p5 }
  0x32   : > { %p506_p9 = pnand %p505_p7, %p499_p6 }
  0x34   : > { %509 = shalt.err (!%p506_p9)
}
  0x35   : > { %s510_s17 = scalar_lea.vmem %s731_s3, 128  ;;  %s614_s23 = smov [#allocation6]  }
  0x36   : > { %p511_p12 = scmp.ne.s32.totalorder %s731_s3, %s510_s17  ;;  %s515_s27 = sshll.u32 %s614_s23, 4  ;;  %s516_s27 = int_to_ptr.vmem [resolvable:$false] %s515_s27 }
  0x37   : > { %s517_s28 = scalar_lea.vmem %s516_s27, 256  ;;  %p518_p3 = scmp.lt.s32.totalorder %s731_s3, %s516_s27 }
  0x38   : > { %p513_p4 = pnand %p511_p12, %p497_p2  ;;  %p519_p10 = scmp.lt.s32.totalorder %s517_s28, %s510_s17 }
  0x3a   : > { %p514_p8 = pneg %p513_p4  ;;  %p520_p11 = por %p519_p10, %p518_p3 }
  0x3c   : > { %p521_p5 = pnand %p520_p11, %p514_p8 }
  0x3e   : > { %524 = shalt.err (!%p521_p5)
}
  0x3f   : > { %s615_s30 = smov 32   ;;  %s616_s6 = smov 2  }
  0x40   : > { %418 = dma.hbm_to_vmem [thread:$0]  (!%p702_p0), %s729_s29, 128, %s731_s3, %s738_s5, %s615_s30, %s615_s30, %s616_s6  }
  0x41   : > { %159 = sbr.rel (%p694_p13) target bundleno = 129 (0x81), region = 28  ;;  %p874_p9 = scmp.ne.s32.totalorder (!%p694_p13), %s868_s18, 0 }
  0x48   : > { %578 = dma.done.wait (%p874_p9), [#allocation5], 32  }
  0x49   : > { %580 = vsyncadd (%p874_p9), [#allocation5], 4294967264  ;;  %s773_s7 = sand.u32 1, %s595_s10   ;;  %p875_p3 = scmp.ne.s32.totalorder %s869_s19, 0 }
  0x4a   : > { %s387_s8 = sshll.u32 %s773_s7, 3  ;;  %s166_s26 = scalar_lea.sflag [#allocation3], %s773_s7 }
  0x4b   : > { %s169_s15 = scalar_lea.vmem [#allocation6], %s387_s8 }
  0x4c   : > { %582 = dma.done.wait (%p875_p3), %s166_s26, 128  }
  0x4d   : > { %584 = vsyncadd (%p875_p3), %s166_s26, 4294967168 }
  0x4e   : > { %174 = sfence }
  0x4f   : > { %s782_s22 = sshll.u32 %s603_s12, 7  ;;  %v191_v0 = vld [vmem:[%s169_s15] sm:$0x3]  ;;  %v389_v1 = vld [vmem:[%s169_s15 + $0x2] sm:$0x3]  ;;  %p876_p13 = scmp.ne.s32.totalorder %s870_s20, 0 }
  0x50   : > { %s199_s18 = sadd.s32 8, %s782_s22  ;;  %s203_s29 = sadd.s32 9, %s782_s22  ;;  %v390_v2 = vld [vmem:[%s169_s15 + $0x4] sm:$0x3]  ;;  %v391_v4 = vld [vmem:[%s169_s15 + $0x6] sm:$0x3] }
  0x51   : > { %s200_s24 = sld [smem:[#allocation2 + %s199_s18]]  ;;  %s208_s5 = sadd.s32 10, %s782_s22 }
  0x52   : > { %s204_s3 = sld [smem:[#allocation2 + %s203_s29]]  ;;  %s213_s19 = sadd.s32 11, %s782_s22 }
  0x53   : > { %s209_s16 = sld [smem:[#allocation2 + %s208_s5]]  ;;  %s224_s27 = sadd.s32 1, %s782_s22 }
  0x54   : > { %s214_s17 = sld [smem:[#allocation2 + %s213_s19]]  ;;  %s229_s28 = sadd.s32 2, %s782_s22 }
  0x55   : > { %s789_s23 = sld [smem:[#allocation2 + %s782_s22]]  ;;  %s234_s8 = sadd.s32 3, %s782_s22 }
  0x56   : > { %s225_s30 = sld [smem:[#allocation2 + %s224_s27]]  ;;  %s242_s18 = sadd.s32 4, %s782_s22 }
  0x57   : > { %v201_v3 = vstv %s200_s24  ;;  %s793_s6 = sld [smem:[#allocation2 + %s229_s28]]  ;;  %s246_s29 = sadd.s32 5, %s782_s22 }
  0x58   : > { %v202_v5 = vmul.f32 %v201_v3, %v191_v0  ;;  %v205_v6 = vstv %s204_s3  ;;  %s796_s26 = sld [smem:[#allocation2 + %s234_s8]]  ;;  %s251_s19 = sadd.s32 6, %s782_s22 }
  0x59   : > { %v206_v7 = vmul.f32 %v389_v1, %v205_v6  ;;  %v210_v8 = vstv %s209_s16  ;;  %s243_s5 = sld [smem:[#allocation2 + %s242_s18]]  ;;  %s256_s27 = sadd.s32 7, %s782_s22 }
  0x5a   : > { %v211_v9 = vmul.f32 %v390_v2, %v210_v8  ;;  %v215_v10 = vstv %s214_s17  ;;  %s247_s24 = sld [smem:[#allocation2 + %s246_s29]]  ;;  %s388_s22 = sshll.u32 %s773_s7, 2 }
  0x5b   : > { %v207_v11 = vadd.f32 %v206_v7, %v202_v5  ;;  %v216_v12 = vmul.f32 %v391_v4, %v215_v10  ;;  %v222_v13 = vstv %s789_s23  ;;  %s252_s15 = sld [smem:[#allocation2 + %s251_s19]]  ;;  %s190_s16 = scalar_lea.vmem [#allocation7], %s388_s22 }
  0x5c   : > { %v226_v14 = vstv %s225_s30  ;;  %s257_s3 = sld [smem:[#allocation2 + %s256_s27]]  ;;  %v223_v16 = vmul.f32 %v222_v13, %v191_v0  ;;  %s280_s17 = sshll.u32 %s190_s16, 4  ;;  %s807_s17 = int_to_ptr.vmem [resolvable:$true] %s280_s17 }
  0x5d   : > { %v212_v15 = vadd.f32 %v211_v9, %v207_v11  ;;  %v227_v17 = vmul.f32 %v389_v1, %v226_v14  ;;  %v231_v19 = vstv %s793_s6  ;;  %s402_s23 = sshll.u32 %s603_s12, 6  ;;  %s266_s8 = scalar_lea.sflag [#allocation4], %s773_s7 }
  0x5e   : > { %v232_v26 = vmul.f32 %v390_v2, %v231_v19  ;;  %v236_v27 = vstv %s796_s26  ;;  %s812_s6 = scalar_lea.hbm %s863_s2, %s402_s23  ;;  %s525_s26 = scalar_lea.vmem %s807_s17, 64 }
  0x5f   : > { %v217_v18 = vadd.f32 %v216_v12, %v212_v15  ;;  %v244_v20 = vstv %s243_s5  ;;  %v228_v25 = vadd.f32 %v227_v17, %v223_v16  ;;  %v237_v33 = vmul.f32 %v391_v4, %v236_v27  ;;  %p526_p8 = scmp.ne.s32.totalorder %s807_s17, %s525_s26  ;;  %s617_s12 = smov [#allocation7]  }
  0x60   : > { %v248_v21 = vstv %s247_s24  ;;  %v245_v23 = vmul.f32 %v244_v20, %v191_v0  ;;  %s529_s18 = sshll.u32 %s617_s12, 4  ;;  %s530_s18 = int_to_ptr.vmem [resolvable:$false] %s529_s18 }
  0x61   : > { %v218_v22 = vadd.f32 1e-07, %v217_v18  ;;  %v249_v24 = vmul.f32 %v389_v1, %v248_v21  ;;  %v253_v28 = vstv %s252_s15  ;;  %v233_v32 = vadd.f32 %v232_v26, %v228_v25  ;;  %p527_p0 = pnand %p526_p8, %p876_p13  ;;  %s531_s29 = scalar_lea.vmem %s530_s18, 128 }
  0x62   : > { %v254_v30 = vmul.f32 %v390_v2, %v253_v28  ;;  %v258_v31 = vstv %s257_s3  ;;  %p532_p6 = scmp.lt.s32.totalorder %s807_s17, %s530_s18  ;;  %p533_p1 = scmp.lt.s32.totalorder %s531_s29, %s525_s26 }
  0x63   : > { %480 = vrcp.f32 %v218_v22  ;;  %v250_v29 = vadd.f32 %v249_v24, %v245_v23  ;;  %v259_v35 = vmul.f32 %v391_v4, %v258_v31  ;;  %v238_v36 = vadd.f32 %v237_v33, %v233_v32  ;;  %p528_p2 = pneg %p527_p0 }
  0x64   : > { %p534_p7 = por %p533_p1, %p532_p6 }
  0x65   : > { %v255_v34 = vadd.f32 %v254_v30, %v250_v29 }
  0x66   : > { %p535_p12 = pnand %p534_p7, %p528_p2 }
  0x67   : > { %v260_v37 = vadd.f32 %v259_v35, %v255_v34 }
  0x6d   : > { %v481_v38 = vpop.eup %480 }
  0x6e   : > { %v239_v39 = vmul.f32 %v481_v38, %v238_v36  ;;  %v261_v40 = vmul.f32 %v481_v38, %v260_v37 }
  0x70   : > { %v393_v41 = vadd.f32 -1.0, %v239_v39  ;;  %v394_v42 = vadd.f32 -1.0, %v261_v40 }
  0x72   : > { %241 = vst [vmem:[%s190_s16] sm:$0x3] %v393_v41  ;;  %395 = vst [vmem:[%s190_s16 + $0x2] sm:$0x3] %v394_v42 }
  0x73   : > { %538 = shalt.err (!%p535_p12)
}
  0x74   : > { %s539_s5 = scalar_lea.hbm %s812_s6, 64  ;;  %s543_s27 = scalar_lea.hbm %s863_s2, 128 }
  0x75   : > { %p540_p4 = scmp.ne.s32.totalorder %s812_s6, %s539_s5  ;;  %p544_p5 = scmp.lt.u32.totalorder %s812_s6, %s863_s2 }
  0x76   : > { %p545_p9 = scmp.lt.u32.totalorder %s543_s27, %s539_s5  ;;  %p547_p8 = scmp.lt.u32.totalorder %s539_s5, %s812_s6 }
  0x77   : > { %p541_p10 = pnand %p540_p4, %p876_p13 }
  0x78   : > { %p546_p3 = por %p545_p9, %p544_p5 }
  0x79   : > { %p542_p11 = pneg %p541_p10 }
  0x7a   : > { %p548_p0 = por %p547_p8, %p546_p3 }
  0x7c   : > { %p549_p2 = pnand %p548_p0, %p542_p11 }
  0x7e   : > { %552 = shalt.err (!%p549_p2)
}
  0x7f   : > { %s618_s22 = smov 32   ;;  %s619_s16 = smov 2  }
  0x80   : > { %409 = dma.vmem_to_hbm [thread:$0]  (%p876_p13), %s807_s17, 64, %s812_s6, %s266_s8, %s618_s22, %s618_s22, %s619_s16  }
  0x81 PF: > { %s295_s23 = sand.u32 1, %s591_s9   ;;  %p877_p6 = scmp.ne.s32.totalorder %s871_s21, 0 }
  0x82   : > { %p878_p1 = scmp.ge.s32.totalorder %s611_s14, 2  ;;  %s296_s28 = scalar_lea.sflag [#allocation4], %s295_s23 }
  0x84   : > { %p420_p7 = pnand %p878_p1, %p877_p6 }
  0x86   : > { %586 = dma.done.wait (!%p420_p7), %s296_s28, 64  }
  0x87   : > { %588 = vsyncadd (!%p420_p7), %s296_s28, 4294967232  ;;  %s19_s14 = sadd.s32 1, %s611_s14   ;;  %s879_s9 = smov %s595_s10 }
  0x88   : > { %p16_p12 = scmp.ge.s32.totalorder %s19_s14, 4   ;;  %s880_s10 = smov %s599_s11 }
  0x89   : > { %s881_s11 = smov %s736_s4  ;;  %s882_s12 = smov %s607_s13 }
  0x8a   : > { %s883_s13 = smov %s885_s25  ;;  %18 = sbr.rel (!%p16_p12) target bundleno = 7 (0x7), region = 82 }
  0x91   :  { %301 = vsyncpa [#allocation3], 1 }
  0x92   :  { %303 = vsyncpa [#allocation3 + $0x1], 1 }
  0x93   :  { %304 = vsyncpa [#allocation4], 1 }
  0x94   :  { %306 = vsyncpa [#allocation4 + $0x1], 1 }
  0x95   :  { %307 = vsyncpa [#allocation5], 1 }
  0x96   :  { %309 = vsyncpa [#allocation5 + $0x1], 1 }

</bundles_post_ra>
